<compile_context>
chip_gen: v6e
topology: v6e:2x2x1
jax: 0.10.0
libtpu: 0.0.40
codegen_flags: <defaults>
</compile_context>

<pallas_src>
import math
import jax
import jax.numpy as jnp
from jax import lax
from jax.experimental import pallas as pl
from jax.experimental.pallas import tpu as pltpu

_A1 = 0.7978845608028654          # sqrt(2/pi)
_A2 = _A1 * 0.044715              # folded cubic coefficient (Horner form)


def _round_up(x, m):
    return (x + m - 1) // m * m


def _cdiv(a, b):
    return (a + b - 1) // b


def convt_gelu_kernel(x_ref, w_ref, o_ref):
    # x_ref: (K_pad, TM)  w_ref: (K_pad, 128)  -> contract dim 0 of both on the MXU.
    y = lax.dot_general(
        x_ref[...], w_ref[...],
        dimension_numbers=(((0,), (0,)), ((), ())),
        preferred_element_type=jnp.float32)                  # (TM, 128), bias folded in
    y2 = y * y
    t = jnp.tanh(y * (_A1 + _A2 * y2))                       # EUP tanh, Horner cubic
    # TODO(synk): optional bf16 store (v5e is write-bound) is numerics-gated; keep f32.
    o_ref[...] = y * (0.5 * t + 0.5)


def _pick_tm(M, tm_cap):
    if M <= 128:
        return _round_up(max(M, 1), 8)        # single tile, lane dim == full dim
    # >= 2 row tiles (v7x megacore) and 128-aligned lane dim for the (K, TM) X block.
    return max(128, min(tm_cap, _round_up(_cdiv(M, 2), 128)))


def model_forward(x, weight, bias, *, tm=4096):
    """x: (N, Cin, H, W) f32; weight: (Cin, Cout, 1, KW) (PyTorch ConvTranspose2d layout);
    bias: (Cout,).  Returns the NCHW output of Model.forward()."""
    N, Cin, H, Win = x.shape
    wCin, Cout, KH, KW = weight.shape
    assert wCin == Cin and KH == 1
    pad = 6
    H_out = H - 2 * pad
    W_full = Win * KW
    W_out = W_full - 2 * pad
    assert H_out > 0 and W_out > 0, "input too small for padding=6"

    # ---- X: crop the padded H rows up-front (never computed), transpose to (Cin, M),
    #      append a ones row (bias fold), zero-pad K->8 and M->M_pad.
    x_c = x[:, :, pad:pad + H_out, :]                                 # (N, Cin, H_out, W)
    M = N * H_out * Win
    TM = _pick_tm(M, tm)
    M_pad = _round_up(M, TM)
    K = Cin + 1
    K_pad = _round_up(K, 8)
    xT = jnp.transpose(x_c, (1, 0, 2, 3)).reshape(Cin, M)             # rows = channels
    xm = jnp.concatenate([xT, jnp.ones((1, M), jnp.float32)], axis=0)  # ones row -> bias
    xm = jnp.pad(xm, ((0, K_pad - K), (0, M_pad - M)))                # zeros: inert

    # ---- Weights packed NHWC-style: column index = r*Cout + co  (lane-dense 120->128).
    C = KW * Cout
    C_pad = _round_up(C, 128)
    w3 = jnp.transpose(weight[:, :, 0, :], (0, 2, 1)).reshape(Cin, C)  # (Cin, KW*Cout)
    bm = jnp.tile(bias, KW).reshape(1, C)                              # bias row (folded)
    wm = jnp.concatenate([w3, bm], axis=0)
    wm = jnp.pad(wm, ((0, K_pad - K), (0, C_pad - C)))                 # (8, 128)

    y = pl.pallas_call(
        convt_gelu_kernel,
        out_shape=jax.ShapeDtypeStruct((M_pad, C_pad), jnp.float32),
        grid=(M_pad // TM,),
        in_specs=[
            pl.BlockSpec((K_pad, TM), lambda i: (0, i)),        # streamed, lane-dense X
            pl.BlockSpec((K_pad, C_pad), lambda i: (0, 0)),     # weight+bias: VMEM-resident
        ],
        out_specs=pl.BlockSpec((TM, C_pad), lambda i: (i, 0)),
        compiler_params=pltpu.CompilerParams(
            dimension_semantics=("parallel",),
            vmem_limit_bytes=32 * 1024 * 1024),
    )(xm, wm)

    # ---- Epilogue: kernel output is already NHWC-ordered; crop width, then ONE standard
    #      NHWC->NCHW transpose on the cropped tensor (module returns NCHW).
    y = y[:M, :C].reshape(N, H_out, W_full, Cout)
    y = y[:, :, pad:pad + W_out, :]
    return jnp.transpose(y, (0, 3, 1, 2))


def reference(x, weight, bias):
    """Pure-JAX reference: explicit transposed-conv scatter math + literal tanh-GELU."""
    N, Cin, H, Win = x.shape
    _, Cout, KH, KW = weight.shape
    pad = 6
    full = jnp.einsum('ncij,cor->noijr', x, weight[:, :, 0, :])
    full = full.reshape(N, Cout, H, Win * KW) + bias[None, :, None, None]
    v1 = full[:, :, pad:H - pad, pad:Win * KW - pad]
    v2 = v1 * 0.5
    v6 = (v1 + v1 * v1 * v1 * 0.044715) * 0.7978845608028654
    return v2 * (jnp.tanh(v6) + 1.0)


if __name__ == "__main__":
    # NOTE: the original script's input (1,4,8,232) makes ConvTranspose2d output height
    # negative ((8-1)*1 - 2*6 + 1 = -4), i.e. PyTorch itself would error.  We use a small
    # valid shape (H must exceed 12) that also exercises multiple grid steps:
    # M = 2*20*16 = 640 rows -> TM=384, M_pad=768, grid=2 (padded remainder tile).
    N, Cin, H, W = 2, 4, 32, 16
    Cout, KH, KW = 24, 1, 5

    key = jax.random.PRNGKey(0)
    k1, k2, k3 = jax.random.split(key, 3)
    x = jax.random.normal(k1, (N, Cin, H, W), dtype=jnp.float32)
    bound = 1.0 / math.sqrt(Cin * KH * KW)
    weight = jax.random.uniform(k2, (Cin, Cout, KH, KW), jnp.float32, -bound, bound)
    bias = jax.random.uniform(k3, (Cout,), jnp.float32, -bound, bound)

    fwd = jax.jit(model_forward)
    out = jax.block_until_ready(fwd(x, weight, bias))
    ref = reference(x, weight, bias)

    assert out.shape == (N, Cout, H - 12, W * KW - 12), out.shape
    err = float(jnp.max(jnp.abs(out - ref)))
    assert err < 1e-4, f"max abs err {err}"
    print("KERNEL_OK")
</pallas_src>

<mosaic_0001>
module attributes {stable_mosaic.version = 11 : i64} {
  func.func @convt_gelu_kernel(%arg0: i32, %arg1: memref<8x384xf32, #tpu.memory_space<vmem>>, %arg2: memref<8x128xf32, #tpu.memory_space<vmem>>, %arg3: memref<384x128xf32, #tpu.memory_space<vmem>>) attributes {dimension_semantics = [#tpu.dimension_semantics<parallel>], iteration_bounds = array<i64: 2>, scalar_prefetch = 0 : i64, scratch_operands = 0 : i64, tpu.core_type = #tpu.core_type<tc>, window_params = [{transform_indices = @transform_0, window_bounds = array<i64: 8, 384>}, {pipeline_mode = #tpu.pipeline_mode<synchronous>, transform_indices = @transform_1, window_bounds = array<i64: 8, 128>}, {transform_indices = @transform_2, window_bounds = array<i64: 384, 128>}]} {
    %c0 = arith.constant 0 : index
    %c0_0 = arith.constant 0 : index
    %0 = vector.load %arg1[%c0, %c0_0] : memref<8x384xf32, #tpu.memory_space<vmem>>, vector<8x384xf32>
    %c0_1 = arith.constant 0 : index
    %c0_2 = arith.constant 0 : index
    %1 = vector.load %arg2[%c0_1, %c0_2] : memref<8x128xf32, #tpu.memory_space<vmem>>, vector<8x128xf32>
    %cst = arith.constant dense<0.000000e+00> : vector<384x128xf32>
    %2 = tpu.matmul %0, %1, %cst {dimension_numbers = #tpu.dot_dimension_numbers<[0], [0], [1], [1], [0, 1, 1, 1], [], []>} : vector<8x384xf32>, vector<8x128xf32>, vector<384x128xf32> -> vector<384x128xf32>
    %3 = arith.mulf %2, %2 : vector<384x128xf32>
    %cst_3 = arith.constant 0.0356774069 : f32
    %4 = vector.broadcast %cst_3 : f32 to vector<384x128xf32>
    %5 = arith.mulf %4, %3 : vector<384x128xf32>
    %cst_4 = arith.constant 0.797884583 : f32
    %6 = vector.broadcast %cst_4 : f32 to vector<384x128xf32>
    %7 = arith.addf %6, %5 : vector<384x128xf32>
    %8 = arith.mulf %2, %7 : vector<384x128xf32>
    %9 = math.tanh %8 : vector<384x128xf32>
    %cst_5 = arith.constant 5.000000e-01 : f32
    %10 = vector.broadcast %cst_5 : f32 to vector<384x128xf32>
    %11 = arith.mulf %10, %9 : vector<384x128xf32>
    %cst_6 = arith.constant 5.000000e-01 : f32
    %12 = vector.broadcast %cst_6 : f32 to vector<384x128xf32>
    %13 = arith.addf %11, %12 : vector<384x128xf32>
    %14 = arith.mulf %2, %13 : vector<384x128xf32>
    %c0_7 = arith.constant 0 : index
    %c0_8 = arith.constant 0 : index
    %15 = vector.load %arg3[%c0_7, %c0_8] : memref<384x128xf32, #tpu.memory_space<vmem>>, vector<384x128xf32>
    tpu.vector_store %arg3[%c0_7, %c0_8], %14 {strides = array<i32>} : memref<384x128xf32, #tpu.memory_space<vmem>>, vector<384x128xf32>,
    return
  }
  func.func @transform_0(%arg0: i32) -> (i32, i32) {
    %c0_i32 = arith.constant 0 : i32
    %c0_i32_0 = arith.constant 0 : i32
    return %c0_i32, %arg0 : i32, i32
  }
  func.func @transform_1(%arg0: i32) -> (i32, i32) {
    %c0_i32 = arith.constant 0 : i32
    %c0_i32_0 = arith.constant 0 : i32
    %c0_i32_1 = arith.constant 0 : i32
    return %c0_i32, %c0_i32_0 : i32, i32
  }
  func.func @transform_2(%arg0: i32) -> (i32, i32) {
    %c0_i32 = arith.constant 0 : i32
    %c0_i32_0 = arith.constant 0 : i32
    return %arg0, %c0_i32 : i32, i32
  }
}

</mosaic_0001>

<bundles_post_ra>
// kernel: tile.9
= control target key start
LH: loop header
LB: loop body
LE: loop exit
PB: predicated region body
PF: predicated region fallthrough
CT: control target
= control target key end

     0   :  { %s45_s10 = smov 96   ;;  %s46_s11 = smov 48   ;;  %vm3_vm0 = vcmask 195584   ;;  %vm9_vm1 = vcmask 982784   ;;  %vm15_vm2 = vcmask 785984   ;;  %vm21_vm3 = vcmask 589184   ;;  %s77_s0 = inlined_call_operand.vmem [shape: f32[5,24], index: 0, kind: input, shape index: {}]   ;;  %s78_s1 = inlined_call_operand.vmem [shape: f32[1,120], index: 1, kind: output, shape index: {}]  }
   0x1   :  { %v37_v0 = vld [vmem:[%s77_s0 + $0x4] sm:$0x1]   ;;  %v39_v1 = vld [vmem:[%s77_s0 + $0x2] sm:$0x1]   ;;  %v38_v2 = vld [vmem:[%s77_s0 + $0x3] sm:$0x1]  }
   0x2   :  { %7 = vrot.lane.b32.xlu0 %v37_v0, %s45_s10  ;;  %19 = vrot.lane.b32.xlu1 %v39_v1, %s46_s11  ;;  %v40_v3 = vld [vmem:[%s77_s0 + $0x1] sm:$0x1]   ;;  %v2_v4 = vld [vmem:[%s77_s0] sm:$0x1]   ;;  %s47_s0 = smov 72   ;;  %s48_s18 = smov 24  }
   0x3   :  { %4 = vst.msk [vmem:[#allocation0] sm:$0x1] %vm3_vm0, %v2_v4   ;;  %vm27_vm4 = vcmask 392384  }
   0x6   :  { %13 = vrot.lane.b32.xlu0 %v38_v2, %s47_s0  ;;  %25 = vrot.lane.b32.xlu1 %v40_v3, %s48_s18 }
  0x74   :  { %v8_v5 = vpop.permute.xlu0 %7   ;;  %v20_v6 = vpop.permute.xlu1 %19  }
  0x75   :  { %10 = vst.msk [vmem:[#allocation0] sm:$0x1] %vm9_vm1, %v8_v5  }
  0x78   :  { %v14_v7 = vpop.permute.xlu0 %13   ;;  %v26_v8 = vpop.permute.xlu1 %25  }
  0x79   :  { %16 = vst.msk [vmem:[#allocation0] sm:$0x1] %vm15_vm2, %v14_v7  }
  0x7a   :  { %22 = vst.msk [vmem:[#allocation0] sm:$0x1] %vm21_vm3, %v20_v6  }
  0x7b   :  { %28 = vst.msk [vmem:[#allocation0] sm:$0x1] %vm27_vm4, %v26_v8  }
  0x82   :  { %v33_v9 = vld [vmem:[#allocation0] sm:$0x1] }
  0x83   :  { %36 = vst [vmem:[%s78_s1] sm:$0x1] %v33_v9 }

// kernel: tile.8
= control target key start
LH: loop header
LB: loop body
LE: loop exit
PB: predicated region body
PF: predicated region fallthrough
CT: control target
= control target key end

     0   :  { %2 = vsyncpa [#allocation1], 0  ;;  %s42_s6 = smov [#allocation0]   ;;  %s59_s0 = inlined_call_operand.hbm [shape: f32[24], index: 0, kind: input, shape index: {}]   ;;  %s60_s1 = inlined_call_operand.vmem [shape: f32[5,24], index: 1, kind: output, shape index: {}]  }
   0x1   :  { %s9_s7 = sshll.u32 %s42_s6, 4  ;;  %s10_s7 = int_to_ptr.vmem [resolvable:$true] %s9_s7 }
   0x2   :  { %s28_s8 = scalar_lea.vmem %s10_s7, 16  ;;  %s32_s9 = scalar_lea.vmem %s10_s7, 32 }
   0x3   :  { %p29_p0 = scmp.ne.s32.totalorder %s10_s7, %s28_s8  ;;  %p33_p1 = scmp.lt.s32.totalorder %s10_s7, %s10_s7 }
   0x4   :  { %p34_p2 = scmp.lt.s32.totalorder %s32_s9, %s28_s8 }
   0x6   :  { %p35_p3 = por %p34_p2, %p33_p1 }
   0x8   :  { %p36_p4 = pnand %p35_p3, %p29_p0 }
   0xa   :  { %39 = shalt.err (!%p36_p4)
}
   0xb   :  { %12 = dma.hbm_to_vmem [thread:$0]  %s59_s0, 16, %s10_s7, [#allocation1]  }
   0xc   :  { %40 = dma.done.wait [#allocation1], 16  }
   0xd   :  { %41 = vsyncadd [#allocation1], 4294967280  ;;  %v16_v0 = vld [vmem:[#allocation0] ss:$0 sm:$0xff] }
   0xe   :  { %17 = vst [vmem:[%s60_s1] sm:$0xff] %v16_v0 }
   0xf   :  { %18 = vsyncpa [#allocation1], 1 }

// kernel: model_forward.1
= control target key start
LH: loop header
LB: loop body
LE: loop exit
PB: predicated region body
PF: predicated region fallthrough
CT: control target
= control target key end

     0   :  { %s1495_s9 = smov 0   ;;  %s1917_s0 = inlined_call_operand.vmem [shape: f32[8,768], index: 0, kind: input, shape index: {}]   ;;  %s1918_s1 = inlined_call_operand.vmem [shape: f32[8,128], index: 1, kind: input, shape index: {}]   ;;  %s1919_s2 = inlined_call_operand.vmem [shape: f32[768,128], index: 2, kind: output, shape index: {}]  }
   0x1 LB: > { %s1185_s10 = sadd.s32 4294967295, %s1478_s9   ;;  %p1189_p0 = scmp.ge.s32.totalorder %s1478_s9, 1  ;;  %s1478_s9 = sphi %s1495_s9, %s12_s9  }
   0x2   : > { %p113_p1 = scmp.lt.s32.totalorder %s1478_s9, 3 }
   0x4   : > { %p114_p2 = pnand %p1189_p0, %p113_p1 }
   0x5   : > { %s135_s11 = smul.u32 (!%p114_p2), 3, %s1185_s10 }
   0x6   : > { %117 = sbr.rel (%p114_p2) target bundleno = 506 (0x1fa), region = 28 }
   0x7   : > { %p136_p3 = scmp.lt.s32.totalorder (!%p114_p2), %s135_s11, 5  ;;  %s141_s18 = smul.u32 (!%p114_p2), 48, %s1185_s10 }
   0x9   : > { %p142_p4 = scmp.lt.s32.totalorder (!%p114_p2), %s141_s18, 95 }
   0xb   : > { %s1921_s11 = smov (!%p136_p3, %s135_s11), 5  ;;  %v150_v2 = vld [vmem:[%s1918_s1] sm:$0xff]  ;;  %vm247_vm0 = vcmask 64512   ;;  %s1923_s18 = smov (!%p142_p4, %s141_s18), 95 }
   0xc   : > { %s1190_s12 = sshll.u32 %s1921_s11, 3  ;;  %1365 = vmatprep.subr.mxu1 %v150_v2  ;;  %1291 = vmatprep.subr.mxu0 %v150_v2  ;;  %s1191_s19 = sshll.u32 %s1923_s18, 3 }
   0xd   : > { %s139_s15 = scalar_lea.vmem %s1917_s0, %s1190_s12  ;;  %1366 = vmatpush3.msra.mxu1 %v150_v2  ;;  %1292 = vmatpush3.msra.mxu0 %v150_v2  ;;  %s1610_s22 = scalar_lea.vmem %s1919_s2, %s1191_s19 }
   0xe   : > { %v148_v0 = vld [vmem:[%s139_s15 + $0x8] sm:$0xff]  ;;  %v149_v1 = vld [vmem:[%s139_s15 + $0x10] sm:$0xff]  ;;  %v147_v3 = vld [vmem:[%s139_s15] sm:$0xff] }
   0xf   : > { %183 = vxpose.xlu0.b32.start.end [1/1] (short) %v148_v0, 128  ;;  %215 = vxpose.xlu1.b32.start.end [1/1] (short) %v149_v1, 128 }
  0x4c   : > { %151 = vxpose.xlu0.b32.start.end [1/1] (short) %v147_v3, 128 }
  0x8b   : > { %v1511_v4 = vpop.trf.xlu0  ;;  %v231_v5 = vpop.trf.xlu1 }
  0x8f   : > { %v1513_v6 = vpop.trf.xlu0  ;;  %v232_v7 = vpop.trf.xlu1 }
  0x93   : > { %v1515_v8 = vpop.trf.xlu0  ;;  %v233_v10 = vpop.trf.xlu1 }
  0x97   : > { %v1517_v9 = vpop.trf.xlu0  ;;  %v234_v12 = vpop.trf.xlu1 }
  0x9b   : > { %v1519_v11 = vpop.trf.xlu0  ;;  %v235_v15 = vpop.trf.xlu1 }
  0x9f   : > { %v1521_v13 = vpop.trf.xlu0  ;;  %v236_v17 = vpop.trf.xlu1 }
  0xa3   : > { %v1523_v14 = vpop.trf.xlu0  ;;  %v237_v20 = vpop.trf.xlu1 }
  0xa7   : > { %v1525_v16 = vpop.trf.xlu0  ;;  %v238_v22 = vpop.trf.xlu1 }
  0xab   : > { %v207_v18 = vpop.trf.xlu0  ;;  %v239_v25 = vpop.trf.xlu1 }
  0xac   : > { %1329 = vmatprep.mubr.msk.f32.mxu1 %vm247_vm0, %v207_v18 }
  0xaf   : > { %v208_v19 = vpop.trf.xlu0  ;;  %v240_v27 = vpop.trf.xlu1 }
  0xb0   : > { %1330 = vmatmul.mubr.msk.f32.vlgmr.msra.gmra.mxu1 %vm247_vm0, %v208_v19 }
  0xb3   : > { %v209_v21 = vpop.trf.xlu0  ;;  %v241_v30 = vpop.trf.xlu1 }
  0xb4   : > { %1332 = vmatprep.mubr.msk.f32.mxu1 %vm247_vm0, %v209_v21 }
  0xb7   : > { %v210_v23 = vpop.trf.xlu0  ;;  %v242_v32 = vpop.trf.xlu1 }
  0xb8   : > { %1333 = vmatmul.mubr.msk.f32.gmra.mxu1 %vm247_vm0, %v210_v23 }
  0xbb   : > { %v211_v24 = vpop.trf.xlu0  ;;  %v243_v35 = vpop.trf.xlu1 }
  0xbc   : > { %1335 = vmatprep.mubr.msk.f32.mxu1 %vm247_vm0, %v211_v24 }
  0xbf   : > { %v212_v26 = vpop.trf.xlu0  ;;  %v244_v37 = vpop.trf.xlu1 }
  0xc0   : > { %1336 = vmatmul.mubr.msk.f32.gmra.mxu1 %vm247_vm0, %v212_v26 }
  0xc3   : > { %v213_v28 = vpop.trf.xlu0  ;;  %v245_v40 = vpop.trf.xlu1 }
  0xc4   : > { %1338 = vmatprep.mubr.msk.f32.mxu1 %vm247_vm0, %v213_v28 }
  0xc7   : > { %v214_v29 = vpop.trf.xlu0  ;;  %v246_v42 = vpop.trf.xlu1 }
  0xc8   : > { %1339 = vmatmul.mubr.msk.f32.gmra.mxu1 %vm247_vm0, %v214_v29 }
  0xc9   : > { %1341 = vmatprep.mubr.msk.f32.mxu1 %vm247_vm0, %v231_v5 }
  0xcb   : > { %v167_v31 = vpop.trf.xlu0 }
  0xcc   : > { %1293 = vmatprep.mubr.msk.f32.mxu0 %vm247_vm0, %v167_v31  ;;  %1342 = vmatmul.mubr.msk.f32.gmra.mxu1 %vm247_vm0, %v232_v7 }
  0xcd   : > { %1344 = vmatprep.mubr.msk.f32.mxu1 %vm247_vm0, %v233_v10 }
  0xcf   : > { %v168_v33 = vpop.trf.xlu0 }
  0xd0   : > { %1294 = vmatmul.mubr.msk.f32.vlgmr.msra.gmra.mxu0 %vm247_vm0, %v168_v33  ;;  %1345 = vmatmul.mubr.msk.f32.gmra.mxu1 %vm247_vm0, %v234_v12 }
  0xd1   : > { %1347 = vmatprep.mubr.msk.f32.mxu1 %vm247_vm0, %v235_v15 }
  0xd3   : > { %v169_v34 = vpop.trf.xlu0 }
  0xd4   : > { %1296 = vmatprep.mubr.msk.f32.mxu0 %vm247_vm0, %v169_v34  ;;  %1348 = vmatmul.mubr.msk.f32.gmra.mxu1 %vm247_vm0, %v236_v17 }
  0xd5   : > { %1350 = vmatprep.mubr.msk.f32.mxu1 %vm247_vm0, %v237_v20 }
  0xd7   : > { %v170_v36 = vpop.trf.xlu0 }
  0xd8   : > { %1297 = vmatmul.mubr.msk.f32.gmra.mxu0 %vm247_vm0, %v170_v36  ;;  %1351 = vmatmul.mubr.msk.f32.gmra.mxu1 %vm247_vm0, %v238_v22 }
  0xd9   : > { %1353 = vmatprep.mubr.msk.f32.mxu1 %vm247_vm0, %v239_v25 }
  0xdb   : > { %v171_v38 = vpop.trf.xlu0 }
  0xdc   : > { %1299 = vmatprep.mubr.msk.f32.mxu0 %vm247_vm0, %v171_v38  ;;  %1354 = vmatmul.mubr.msk.f32.gmra.mxu1 %vm247_vm0, %v240_v27 }
  0xdd   : > { %1356 = vmatprep.mubr.msk.f32.mxu1 %vm247_vm0, %v241_v30 }
  0xdf   : > { %v172_v39 = vpop.trf.xlu0 }
  0xe0   : > { %1300 = vmatmul.mubr.msk.f32.gmra.mxu0 %vm247_vm0, %v172_v39  ;;  %1357 = vmatmul.mubr.msk.f32.gmra.mxu1 %vm247_vm0, %v242_v32 }
  0xe1   : > { %1359 = vmatprep.mubr.msk.f32.mxu1 %vm247_vm0, %v243_v35 }
  0xe3   : > { %v173_v41 = vpop.trf.xlu0 }
  0xe4   : > { %1302 = vmatprep.mubr.msk.f32.mxu0 %vm247_vm0, %v173_v41  ;;  %1360 = vmatmul.mubr.msk.f32.gmra.mxu1 %vm247_vm0, %v244_v37 }
  0xe5   : > { %1362 = vmatprep.mubr.msk.f32.mxu1 %vm247_vm0, %v245_v40 }
  0xe7   : > { %v174_v43 = vpop.trf.xlu0 }
  0xe8   : > { %1303 = vmatmul.mubr.msk.f32.gmra.mxu0 %vm247_vm0, %v174_v43  ;;  %1363 = vmatmul.mubr.msk.f32.gmra.mxu1 %vm247_vm0, %v246_v42 }
  0xeb   : > { %v175_v44 = vpop.trf.xlu0 }
  0xec   : > { %1305 = vmatprep.mubr.msk.f32.mxu0 %vm247_vm0, %v175_v44 }
  0xef   : > { %v176_v45 = vpop.trf.xlu0 }
  0xf0   : > { %1306 = vmatmul.mubr.msk.f32.gmra.mxu0 %vm247_vm0, %v176_v45 }
  0xf3   : > { %v177_v46 = vpop.trf.xlu0 }
  0xf4   : > { %1308 = vmatprep.mubr.msk.f32.mxu0 %vm247_vm0, %v177_v46 }
  0xf7   : > { %v178_v47 = vpop.trf.xlu0 }
  0xf8   : > { %1309 = vmatmul.mubr.msk.f32.gmra.mxu0 %vm247_vm0, %v178_v47 }
  0xfb   : > { %v179_v48 = vpop.trf.xlu0 }
  0xfc   : > { %1311 = vmatprep.mubr.msk.f32.mxu0 %vm247_vm0, %v179_v48 }
  0xff   : > { %v180_v49 = vpop.trf.xlu0 }
 0x100   : > { %1312 = vmatmul.mubr.msk.f32.gmra.mxu0 %vm247_vm0, %v180_v49 }
 0x103   : > { %v181_v50 = vpop.trf.xlu0 }
 0x104   : > { %1314 = vmatprep.mubr.msk.f32.mxu0 %vm247_vm0, %v181_v50 }
 0x107   : > { %v182_v51 = vpop.trf.xlu0 }
 0x108   : > { %1315 = vmatmul.mubr.msk.f32.gmra.mxu0 %vm247_vm0, %v182_v51 }
 0x109   : > { %1317 = vmatprep.mubr.msk.f32.mxu0 %vm247_vm0, %v1511_v4 }
 0x10c   : > { %1318 = vmatmul.mubr.msk.f32.gmra.mxu0 %vm247_vm0, %v1513_v6 }
 0x10d   : > { %1320 = vmatprep.mubr.msk.f32.mxu0 %vm247_vm0, %v1515_v8 }
 0x110   : > { %1321 = vmatmul.mubr.msk.f32.gmra.mxu0 %vm247_vm0, %v1517_v9 }
 0x111   : > { %1323 = vmatprep.mubr.msk.f32.mxu0 %vm247_vm0, %v1519_v11 }
 0x114   : > { %1324 = vmatmul.mubr.msk.f32.gmra.mxu0 %vm247_vm0, %v1521_v13 }
 0x115   : > { %1326 = vmatprep.mubr.msk.f32.mxu0 %vm247_vm0, %v1523_v14 }
 0x118   : > { %1327 = vmatmul.mubr.msk.f32.gmra.mxu0 %vm247_vm0, %v1525_v16 }
 0x170   : > { %v1331_v52 = vpop.f32.mrf.mxu1 }
 0x171   : > { %v722_v53 = vmul.f32 %v1331_v52, %v1331_v52 }
 0x172   : > { %v578_v54 = vpop.f32.mrf.mxu1 }
 0x173   : > { %v770_v55 = vmul.f32 0.035677407, %v722_v53  ;;  %v721_v56 = vmul.f32 %v578_v54, %v578_v54 }
 0x175   : > { %v818_v57 = vadd.f32 0.7978846, %v770_v55  ;;  %v769_v58 = vmul.f32 0.035677407, %v721_v56 }
 0x177   : > { %v866_v59 = vmul.f32 %v1331_v52, %v818_v57  ;;  %v817_v60 = vadd.f32 0.7978846, %v769_v58 }
 0x178   : > { %v1583_v61 = vpop.f32.mrf.mxu1 }
 0x179   : > { %1376 = vtanh.f32 %v866_v59  ;;  %v865_v62 = vmul.f32 %v817_v60, %v578_v54  ;;  %v724_v63 = vmul.f32 %v1583_v61, %v1583_v61 }
 0x17a   : > { %v1587_v0 = vpop.f32.mrf.mxu1 }
 0x17b   : > { %1378 = vtanh.f32 %v865_v62  ;;  %v772_v1 = vmul.f32 0.035677407, %v724_v63  ;;  %v723_v2 = vmul.f32 %v1587_v0, %v1587_v0 }
 0x17d   : > { %v820_v3 = vadd.f32 0.7978846, %v772_v1  ;;  %v771_v4 = vmul.f32 0.035677407, %v723_v2 }
 0x17f   : > { %v868_v5 = vmul.f32 %v1583_v61, %v820_v3  ;;  %v819_v6 = vadd.f32 0.7978846, %v771_v4 }
 0x180   : > { %v1594_v7 = vpop.f32.mrf.mxu1 }
 0x181   : > { %1380 = vtanh.f32 %v868_v5  ;;  %v867_v8 = vmul.f32 %v819_v6, %v1587_v0  ;;  %v726_v9 = vmul.f32 %v1594_v7, %v1594_v7 }
 0x182   : > { %v1599_v10 = vpop.f32.mrf.mxu1 }
 0x183   : > { %1382 = vtanh.f32 %v867_v8  ;;  %v774_v11 = vmul.f32 0.035677407, %v726_v9  ;;  %v725_v12 = vmul.f32 %v1599_v10, %v1599_v10 }
 0x185   : > { %v822_v13 = vadd.f32 0.7978846, %v774_v11  ;;  %v773_v14 = vmul.f32 0.035677407, %v725_v12 }
 0x186   : > { %v1377_v15 = vpop.eup %1376 }
 0x187   : > { %v962_v16 = vmul.f32 0.5, %v1377_v15  ;;  %v870_v17 = vmul.f32 %v1594_v7, %v822_v13  ;;  %v821_v18 = vadd.f32 0.7978846, %v773_v14 }
 0x188   : > { %v1379_v19 = vpop.eup %1378  ;;  %v1604_v20 = vpop.f32.mrf.mxu1 }
 0x189   : > { %v1010_v21 = vadd.f32 0.5, %v962_v16  ;;  %v961_v22 = vmul.f32 0.5, %v1379_v19  ;;  %1384 = vtanh.f32 %v870_v17  ;;  %v869_v23 = vmul.f32 %v821_v18, %v1599_v10 }
 0x18a   : > { %v728_v24 = vmul.f32 %v1604_v20, %v1604_v20  ;;  %v1614_v25 = vpop.f32.mrf.mxu1 }
 0x18b   : > { %v1058_v26 = vmul.f32 %v1331_v52, %v1010_v21  ;;  %v1009_v27 = vadd.f32 0.5, %v961_v22  ;;  %1386 = vtanh.f32 %v869_v23  ;;  %v727_v28 = vmul.f32 %v1614_v25, %v1614_v25 }
 0x18c   : > { %v776_v29 = vmul.f32 0.035677407, %v728_v24  ;;  %v1618_v30 = vpop.f32.mrf.mxu1 }
 0x18d   : > { %1106 = vst [vmem:[%s1610_s22 + $0xc8] sm:$0xff] %v1058_v26  ;;  %v1057_v31 = vmul.f32 %v1009_v27, %v578_v54  ;;  %v775_v32 = vmul.f32 0.035677407, %v727_v28  ;;  %v730_v33 = vmul.f32 %v1618_v30, %v1618_v30 }
 0x18e   : > { %v1381_v34 = vpop.eup %1380  ;;  %v824_v35 = vadd.f32 0.7978846, %v776_v29  ;;  %v1623_v36 = vpop.f32.mrf.mxu1 }
 0x18f   : > { %1105 = vst [vmem:[%s1610_s22 + $0xc0] sm:$0xff] %v1057_v31  ;;  %v964_v37 = vmul.f32 0.5, %v1381_v34  ;;  %v823_v38 = vadd.f32 0.7978846, %v775_v32  ;;  %v778_v39 = vmul.f32 0.035677407, %v730_v33  ;;  %v729_v40 = vmul.f32 %v1623_v36, %v1623_v36 }
 0x190   : > { %v1383_v41 = vpop.eup %1382  ;;  %v872_v42 = vmul.f32 %v1604_v20, %v824_v35  ;;  %v1629_v43 = vpop.f32.mrf.mxu0 }
 0x191   : > { %v1631_v44 = vpop.f32.mrf.mxu1  ;;  %v1012_v45 = vadd.f32 0.5, %v964_v37  ;;  %v963_v46 = vmul.f32 0.5, %v1383_v41  ;;  %v871_v47 = vmul.f32 %v823_v38, %v1614_v25  ;;  %v826_v48 = vadd.f32 0.7978846, %v778_v39 }
 0x192   : > { %1388 = vtanh.f32 %v872_v42  ;;  %v777_v49 = vmul.f32 0.035677407, %v729_v40  ;;  %v698_v50 = vmul.f32 %v1629_v43, %v1629_v43  ;;  %v732_v51 = vmul.f32 %v1631_v44, %v1631_v44  ;;  %v1638_v52 = vpop.f32.mrf.mxu0 }
 0x193   : > { %v1640_v53 = vpop.f32.mrf.mxu1  ;;  %v1060_v54 = vmul.f32 %v1583_v61, %v1012_v45  ;;  %v1011_v55 = vadd.f32 0.5, %v963_v46  ;;  %1390 = vtanh.f32 %v871_v47  ;;  %v874_v56 = vmul.f32 %v1618_v30, %v826_v48 }
 0x194   : > { %v825_v57 = vadd.f32 0.7978846, %v777_v49  ;;  %v746_v58 = vmul.f32 0.035677407, %v698_v50  ;;  %v780_v59 = vmul.f32 0.035677407, %v732_v51  ;;  %v697_v60 = vmul.f32 %v1638_v52, %v1638_v52 }
 0x195   : > { %v1646_v62 = vpop.f32.mrf.mxu1  ;;  %1108 = vst [vmem:[%s1610_s22 + $0xd8] sm:$0xff] %v1060_v54  ;;  %v1059_v63 = vmul.f32 %v1011_v55, %v1587_v0  ;;  %1392 = vtanh.f32 %v874_v56  ;;  %v731_v61 = vmul.f32 %v1640_v53, %v1640_v53 }
 0x196   : > { %v734_v1 = vmul.f32 %v1646_v62, %v1646_v62  ;;  %v1385_v2 = vpop.eup %1384  ;;  %v873_v3 = vmul.f32 %v825_v57, %v1623_v36  ;;  %v794_v4 = vadd.f32 0.7978846, %v746_v58  ;;  %v828_v5 = vadd.f32 0.7978846, %v780_v59 }
 0x197   : > { %v745_v6 = vmul.f32 0.035677407, %v697_v60  ;;  %v1655_v8 = vpop.f32.mrf.mxu1  ;;  %1107 = vst [vmem:[%s1610_s22 + $0xd0] sm:$0xff] %v1059_v63  ;;  %v966_v9 = vmul.f32 0.5, %v1385_v2  ;;  %v779_v11 = vmul.f32 0.035677407, %v731_v61 }
 0x198   : > { %v782_v12 = vmul.f32 0.035677407, %v734_v1  ;;  %v733_v0 = vmul.f32 %v1655_v8, %v1655_v8  ;;  %v1387_v13 = vpop.eup %1386  ;;  %1394 = vtanh.f32 %v873_v3  ;;  %v842_v14 = vmul.f32 %v1629_v43, %v794_v4  ;;  %v1662_v17 = vpop.f32.mrf.mxu0 }
 0x199   : > { %v876_v15 = vmul.f32 %v1631_v44, %v828_v5  ;;  %v793_v16 = vadd.f32 0.7978846, %v745_v6  ;;  %v1664_v18 = vpop.f32.mrf.mxu1  ;;  %v1014_v19 = vadd.f32 0.5, %v966_v9  ;;  %v965_v21 = vmul.f32 0.5, %v1387_v13 }
 0x19a   : > { %v827_v22 = vadd.f32 0.7978846, %v779_v11  ;;  %v830_v23 = vadd.f32 0.7978846, %v782_v12  ;;  %1396 = vtanh.f32 %v842_v14  ;;  %v781_v26 = vmul.f32 0.035677407, %v733_v0  ;;  %v1669_v28 = vpop.f32.mrf.mxu0 }
 0x19b   : > { %v841_v24 = vmul.f32 %v793_v16, %v1638_v52  ;;  %v700_v27 = vmul.f32 %v1662_v17, %v1662_v17  ;;  %v1671_v29 = vpop.f32.mrf.mxu1  ;;  %v1062_v31 = vmul.f32 %v1594_v7, %v1014_v19  ;;  %v1013_v32 = vadd.f32 0.5, %v965_v21 }
 0x19c   : > { %1398 = vtanh.f32 %v876_v15  ;;  %v875_v33 = vmul.f32 %v827_v22, %v1640_v53  ;;  %v878_v34 = vmul.f32 %v1646_v62, %v830_v23  ;;  %v829_v35 = vadd.f32 0.7978846, %v781_v26 }
 0x19d   : > { %1400 = vtanh.f32 %v841_v24  ;;  %v748_v37 = vmul.f32 0.035677407, %v700_v27  ;;  %v1676_v38 = vpop.f32.mrf.mxu1  ;;  %1110 = vst [vmem:[%s1610_s22 + $0xe8] sm:$0xff] %v1062_v31  ;;  %v1061_v39 = vmul.f32 %v1013_v32, %v1599_v10  ;;  %v699_v40 = vmul.f32 %v1669_v28, %v1669_v28 }
 0x19e   : > { %1402 = vtanh.f32 %v875_v33  ;;  %v736_v7 = vmul.f32 %v1664_v18, %v1664_v18  ;;  %v877_v41 = vmul.f32 %v829_v35, %v1655_v8  ;;  %v735_v45 = vmul.f32 %v1671_v29, %v1671_v29 }
 0x19f   : > { %1404 = vtanh.f32 %v878_v34  ;;  %v796_v42 = vadd.f32 0.7978846, %v748_v37  ;;  %v1687_v46 = vpop.f32.mrf.mxu1  ;;  %v1389_v47 = vpop.eup %1388  ;;  %1109 = vst [vmem:[%s1610_s22 + $0xe0] sm:$0xff] %v1061_v39  ;;  %v747_v48 = vmul.f32 0.035677407, %v699_v40  ;;  %v738_v49 = vmul.f32 %v1676_v38, %v1676_v38 }
 0x1a0   : > { %v784_v10 = vmul.f32 0.035677407, %v736_v7  ;;  %v737_v50 = vmul.f32 %v1687_v46, %v1687_v46  ;;  %v1391_v51 = vpop.eup %1390  ;;  %v968_v54 = vmul.f32 0.5, %v1389_v47  ;;  %1406 = vtanh.f32 %v877_v41  ;;  %v1695_v57 = vpop.f32.mrf.mxu0 }
 0x1a1   : > { %v844_v55 = vmul.f32 %v1662_v17, %v796_v42  ;;  %v783_v56 = vmul.f32 0.035677407, %v735_v45  ;;  %v967_v58 = vmul.f32 0.5, %v1391_v51  ;;  %v795_v59 = vadd.f32 0.7978846, %v747_v48  ;;  %v1718_v41 = vpop.f32.mrf.mxu1 }
 0x1a2   : > { %v832_v60 = vadd.f32 0.7978846, %v784_v10  ;;  %v702_v63 = vmul.f32 %v1695_v57, %v1695_v57  ;;  %v1393_v61 = vpop.eup %1392  ;;  %v1016_v1 = vadd.f32 0.5, %v968_v54  ;;  %v1699_v3 = vpop.f32.mrf.mxu0  ;;  %v786_v4 = vmul.f32 0.035677407, %v738_v49 }
 0x1a3   : > { %1408 = vtanh.f32 %v844_v55  ;;  %v831_v2 = vadd.f32 0.7978846, %v783_v56  ;;  %v1015_v5 = vadd.f32 0.5, %v967_v58  ;;  %v970_v6 = vmul.f32 0.5, %v1393_v61 }
 0x1a4   : > { %v843_v9 = vmul.f32 %v795_v59, %v1669_v28  ;;  %v880_v11 = vmul.f32 %v1664_v18, %v832_v60  ;;  %v1064_v12 = vmul.f32 %v1604_v20, %v1016_v1  ;;  %v750_v13 = vmul.f32 0.035677407, %v702_v63 }
 0x1a5   : > { %v879_v0 = vmul.f32 %v831_v2, %v1671_v29  ;;  %v701_v14 = vmul.f32 %v1699_v3, %v1699_v3  ;;  %v1395_v15 = vpop.eup %1394  ;;  %v1063_v16 = vmul.f32 %v1015_v5, %v1614_v25  ;;  %v1018_v19 = vadd.f32 0.5, %v970_v6  ;;  %v1730_v2 = vpop.f32.mrf.mxu1 }
 0x1a6   : > { %1410 = vtanh.f32 %v843_v9  ;;  %v834_v21 = vadd.f32 0.7978846, %v786_v4  ;;  %1112 = vst [vmem:[%s1610_s22 + $0xf8] sm:$0xff] %v1064_v12  ;;  %v969_v22 = vmul.f32 0.5, %v1395_v15  ;;  %v798_v23 = vadd.f32 0.7978846, %v750_v13 }
 0x1a7   : > { %1412 = vtanh.f32 %v880_v11  ;;  %v749_v24 = vmul.f32 0.035677407, %v701_v14  ;;  %v1397_v26 = vpop.eup %1396  ;;  %1111 = vst [vmem:[%s1610_s22 + $0xf0] sm:$0xff] %v1063_v16  ;;  %v1066_v20 = vmul.f32 %v1618_v30, %v1018_v19  ;;  %v785_v31 = vmul.f32 0.035677407, %v737_v50 }
 0x1a8   : > { %1414 = vtanh.f32 %v879_v0  ;;  %v882_v27 = vmul.f32 %v1676_v38, %v834_v21  ;;  %v1017_v33 = vadd.f32 0.5, %v969_v22  ;;  %v938_v25 = vmul.f32 0.5, %v1397_v26  ;;  %v1713_v37 = vpop.f32.mrf.mxu0  ;;  %v1748_v22 = vpop.f32.mrf.mxu1 }
 0x1a9   : > { %v1399_v32 = vpop.eup %1398  ;;  %v846_v34 = vmul.f32 %v1695_v57, %v798_v23  ;;  %v797_v35 = vadd.f32 0.7978846, %v749_v24  ;;  %1114 = vst [vmem:[%s1610_s22 + $0x108] sm:$0xff] %v1066_v20  ;;  %v833_v7 = vadd.f32 0.7978846, %v785_v31  ;;  %v704_v30 = vmul.f32 %v1713_v37, %v1713_v37 }
 0x1aa   : > { %v1401_v39 = vpop.eup %1400  ;;  %v972_v40 = vmul.f32 0.5, %v1399_v32  ;;  %1416 = vtanh.f32 %v882_v27  ;;  %v1065_v45 = vmul.f32 %v1017_v33, %v1623_v36  ;;  %v986_v47 = vadd.f32 0.5, %v938_v25  ;;  %v1721_v10 = vpop.f32.mrf.mxu0 }
 0x1ab   : > { %v1403_v42 = vpop.eup %1402  ;;  %v937_v48 = vmul.f32 0.5, %v1401_v39  ;;  %1418 = vtanh.f32 %v846_v34  ;;  %v845_v54 = vmul.f32 %v797_v35, %v1699_v3  ;;  %v881_v55 = vmul.f32 %v833_v7, %v1687_v46 }
 0x1ac   : > { %v1405_v49 = vpop.eup %1404  ;;  %v1020_v50 = vadd.f32 0.5, %v972_v40  ;;  %v971_v51 = vmul.f32 0.5, %v1403_v42  ;;  %1113 = vst [vmem:[%s1610_s22 + $0x100] sm:$0xff] %v1065_v45  ;;  %v1034_v56 = vmul.f32 %v1629_v43, %v986_v47  ;;  %v752_v36 = vmul.f32 0.035677407, %v704_v30 }
 0x1ad   : > { %v985_v58 = vadd.f32 0.5, %v937_v48  ;;  %v974_v59 = vmul.f32 0.5, %v1405_v49  ;;  %v1407_v60 = vpop.eup %1406  ;;  %1420 = vtanh.f32 %v845_v54  ;;  %v703_v1 = vmul.f32 %v1721_v10, %v1721_v10 }
 0x1ae   : > { %v1068_v63 = vmul.f32 %v1631_v44, %v1020_v50  ;;  %v1019_v61 = vadd.f32 0.5, %v971_v51  ;;  %1082 = vst [vmem:[%s1610_s22 + $0x8] sm:$0xff] %v1034_v56  ;;  %v973_v5 = vmul.f32 0.5, %v1407_v60  ;;  %1422 = vtanh.f32 %v881_v55  ;;  %v1764_v51 = vpop.f32.mrf.mxu1 }
 0x1af   : > { %v1033_v4 = vmul.f32 %v985_v58, %v1638_v52  ;;  %v1022_v43 = vadd.f32 0.5, %v974_v59  ;;  %v800_v44 = vadd.f32 0.7978846, %v752_v36  ;;  %v751_v11 = vmul.f32 0.035677407, %v703_v1 }
 0x1b0   : > { %v1409_v6 = vpop.eup %1408  ;;  %1116 = vst [vmem:[%s1610_s22 + $0x118] sm:$0xff] %v1068_v63  ;;  %v1067_v9 = vmul.f32 %v1019_v61, %v1640_v53  ;;  %v740_v12 = vmul.f32 %v1718_v41, %v1718_v41  ;;  %v1021_v13 = vadd.f32 0.5, %v973_v5  ;;  %v739_v52 = vmul.f32 %v1730_v2, %v1730_v2  ;;  %v1742_v15 = vpop.f32.mrf.mxu0 }
 0x1b1   : > { %1081 = vst [vmem:[%s1610_s22] sm:$0xff] %v1033_v4  ;;  %v1070_v0 = vmul.f32 %v1646_v62, %v1022_v43  ;;  %v940_v14 = vmul.f32 0.5, %v1409_v6  ;;  %v848_v16 = vmul.f32 %v1713_v37, %v800_v44  ;;  %v799_v53 = vadd.f32 0.7978846, %v751_v11  ;;  %v1771_v63 = vpop.f32.mrf.mxu1 }
 0x1b2   : > { %1115 = vst [vmem:[%s1610_s22 + $0x110] sm:$0xff] %v1067_v9  ;;  %v788_v19 = vmul.f32 0.035677407, %v740_v12  ;;  %v706_v21 = vmul.f32 %v1742_v15, %v1742_v15  ;;  %v1069_v62 = vmul.f32 %v1021_v13, %v1655_v8  ;;  %v787_v26 = vmul.f32 0.035677407, %v739_v52  ;;  %v1755_v25 = vpop.f32.mrf.mxu0 }
 0x1b3   : > { %v1411_v23 = vpop.eup %1410  ;;  %1118 = vst [vmem:[%s1610_s22 + $0x128] sm:$0xff] %v1070_v0  ;;  %v988_v24 = vadd.f32 0.5, %v940_v14  ;;  %v742_v20 = vmul.f32 %v1748_v22, %v1748_v22  ;;  %1424 = vtanh.f32 %v848_v16  ;;  %v847_v32 = vmul.f32 %v799_v53, %v1721_v10  ;;  %v1785_v53 = vpop.f32.mrf.mxu1 }
 0x1b4   : > { %v1413_v27 = vpop.eup %1412  ;;  %v939_v31 = vmul.f32 0.5, %v1411_v23  ;;  %v836_v33 = vadd.f32 0.7978846, %v788_v19  ;;  %1117 = vst [vmem:[%s1610_s22 + $0x120] sm:$0xff] %v1069_v62  ;;  %v835_v8 = vadd.f32 0.7978846, %v787_v26  ;;  %v705_v50 = vmul.f32 %v1755_v25, %v1755_v25 }
 0x1b5   : > { %v1415_v34 = vpop.eup %1414  ;;  %v1036_v35 = vmul.f32 %v1662_v17, %v988_v24  ;;  %v976_v39 = vmul.f32 0.5, %v1413_v27  ;;  %v754_v40 = vmul.f32 0.035677407, %v706_v21  ;;  %1426 = vtanh.f32 %v847_v32 }
 0x1b6   : > { %v987_v7 = vadd.f32 0.5, %v939_v31  ;;  %v975_v30 = vmul.f32 0.5, %v1415_v34  ;;  %v884_v42 = vmul.f32 %v1718_v41, %v836_v33  ;;  %v883_v48 = vmul.f32 %v835_v8, %v1730_v2 }
 0x1b7   : > { %v1417_v45 = vpop.eup %1416  ;;  %1084 = vst [vmem:[%s1610_s22 + $0x18] sm:$0xff] %v1036_v35  ;;  %v1024_v47 = vadd.f32 0.5, %v976_v39  ;;  %v802_v49 = vadd.f32 0.7978846, %v754_v40  ;;  %v790_v4 = vmul.f32 0.035677407, %v742_v20  ;;  %v743_v31 = vmul.f32 %v1785_v53, %v1785_v53 }
 0x1b8   : > { %v1419_v17 = vpop.eup %1418  ;;  %v1035_v54 = vmul.f32 %v987_v7, %v1669_v28  ;;  %v1023_v55 = vadd.f32 0.5, %v975_v30  ;;  %v978_v56 = vmul.f32 0.5, %v1417_v45  ;;  %1428 = vtanh.f32 %v884_v42  ;;  %v1769_v60 = vpop.f32.mrf.mxu0 }
 0x1b9   : > { %v1072_v58 = vmul.f32 %v1664_v18, %v1024_v47  ;;  %v942_v59 = vmul.f32 0.5, %v1419_v17  ;;  %1430 = vtanh.f32 %v883_v48  ;;  %v850_v36 = vmul.f32 %v1742_v15, %v802_v49 }
 0x1ba   : > { %1083 = vst [vmem:[%s1610_s22 + $0x10] sm:$0xff] %v1035_v54  ;;  %v1071_v61 = vmul.f32 %v1023_v55, %v1671_v29  ;;  %v1026_v1 = vadd.f32 0.5, %v978_v56  ;;  %v753_v28 = vmul.f32 0.035677407, %v705_v50  ;;  %v1421_v43 = vpop.eup %1420  ;;  %v741_v18 = vmul.f32 %v1764_v51, %v1764_v51  ;;  %v1780_v9 = vpop.f32.mrf.mxu0 }
 0x1bb   : > { %1120 = vst [vmem:[%s1610_s22 + $0x138] sm:$0xff] %v1072_v58  ;;  %v990_v5 = vadd.f32 0.5, %v942_v59  ;;  %1432 = vtanh.f32 %v850_v36  ;;  %v708_v6 = vmul.f32 %v1769_v60, %v1769_v60  ;;  %v1423_v44 = vpop.eup %1422  ;;  %v941_v29 = vmul.f32 0.5, %v1421_v43 }
 0x1bc   : > { %1119 = vst [vmem:[%s1610_s22 + $0x130] sm:$0xff] %v1071_v61  ;;  %v1074_v11 = vmul.f32 %v1676_v38, %v1026_v1  ;;  %v801_v12 = vadd.f32 0.7978846, %v753_v28  ;;  %v838_v0 = vadd.f32 0.7978846, %v790_v4  ;;  %v977_v14 = vmul.f32 0.5, %v1423_v44 }
 0x1bd   : > { %v1038_v13 = vmul.f32 %v1695_v57, %v990_v5  ;;  %v789_v52 = vmul.f32 0.035677407, %v741_v18  ;;  %v756_v16 = vmul.f32 0.035677407, %v708_v6  ;;  %v989_v19 = vadd.f32 0.5, %v941_v29 }
 0x1be   : > { %1122 = vst [vmem:[%s1610_s22 + $0x148] sm:$0xff] %v1074_v11  ;;  %v849_v21 = vmul.f32 %v801_v12, %v1755_v25  ;;  %v886_v23 = vmul.f32 %v1748_v22, %v838_v0  ;;  %v707_v62 = vmul.f32 %v1780_v9, %v1780_v9  ;;  %v1025_v38 = vadd.f32 0.5, %v977_v14 }
 0x1bf   : > { %1086 = vst [vmem:[%s1610_s22 + $0x28] sm:$0xff] %v1038_v13  ;;  %v837_v24 = vadd.f32 0.7978846, %v789_v52  ;;  %v804_v26 = vadd.f32 0.7978846, %v756_v16  ;;  %v744_v57 = vmul.f32 %v1771_v63, %v1771_v63  ;;  %v1037_v20 = vmul.f32 %v989_v19, %v1699_v3 }
 0x1c0   : > { %1434 = vtanh.f32 %v849_v21  ;;  %v755_v27 = vmul.f32 0.035677407, %v707_v62  ;;  %v1425_v32 = vpop.eup %1424  ;;  %v1073_v33 = vmul.f32 %v1025_v38, %v1687_v46  ;;  %v1801_v39 = vpop.f32.mrf.mxu0  ;;  %v791_v42 = vmul.f32 0.035677407, %v743_v31 }
 0x1c1   : > { %1436 = vtanh.f32 %v886_v23  ;;  %v885_v34 = vmul.f32 %v837_v24, %v1764_v51  ;;  %v852_v35 = vmul.f32 %v1769_v60, %v804_v26  ;;  %1085 = vst [vmem:[%s1610_s22 + $0x20] sm:$0xff] %v1037_v20  ;;  %v944_v8 = vmul.f32 0.5, %v1425_v32 }
 0x1c2   : > { %v803_v40 = vadd.f32 0.7978846, %v755_v27  ;;  %v792_v3 = vmul.f32 0.035677407, %v744_v57  ;;  %v710_v7 = vmul.f32 %v1801_v39, %v1801_v39  ;;  %v1427_v30 = vpop.eup %1426  ;;  %1121 = vst [vmem:[%s1610_s22 + $0x140] sm:$0xff] %v1073_v33  ;;  %v1807_v45 = vpop.f32.mrf.mxu0 }
 0x1c3   : > { %1438 = vtanh.f32 %v885_v34  ;;  %v992_v46 = vadd.f32 0.5, %v944_v8  ;;  %v943_v47 = vmul.f32 0.5, %v1427_v30  ;;  %v839_v17 = vadd.f32 0.7978846, %v791_v42 }
 0x1c4   : > { %1440 = vtanh.f32 %v852_v35  ;;  %v851_v48 = vmul.f32 %v803_v40, %v1780_v9  ;;  %v840_v50 = vadd.f32 0.7978846, %v792_v3  ;;  %v758_v54 = vmul.f32 0.035677407, %v710_v7 }
 0x1c5   : > { %v1429_v49 = vpop.eup %1428  ;;  %v709_v55 = vmul.f32 %v1807_v45, %v1807_v45  ;;  %v1040_v58 = vmul.f32 %v1713_v37, %v992_v46  ;;  %v991_v59 = vadd.f32 0.5, %v943_v47  ;;  %v887_v28 = vmul.f32 %v839_v17, %v1785_v53 }
 0x1c6   : > { %v1431_v56 = vpop.eup %1430  ;;  %v980_v36 = vmul.f32 0.5, %v1429_v49  ;;  %1442 = vtanh.f32 %v851_v48  ;;  %v888_v1 = vmul.f32 %v1771_v63, %v840_v50  ;;  %v806_v4 = vadd.f32 0.7978846, %v758_v54 }
 0x1c7   : > { %v979_v61 = vmul.f32 0.5, %v1431_v56  ;;  %1088 = vst [vmem:[%s1610_s22 + $0x38] sm:$0xff] %v1040_v58  ;;  %v1039_v5 = vmul.f32 %v991_v59, %v1721_v10  ;;  %v757_v6 = vmul.f32 0.035677407, %v709_v55 }
 0x1c8   : > { %v1433_v43 = vpop.eup %1432  ;;  %v1028_v18 = vadd.f32 0.5, %v980_v36  ;;  %1444 = vtanh.f32 %v888_v1  ;;  %v854_v37 = vmul.f32 %v1801_v39, %v806_v4  ;;  %v1818_v11 = vpop.f32.mrf.mxu0 }
 0x1c9   : > { %v1027_v44 = vadd.f32 0.5, %v979_v61  ;;  %v946_v29 = vmul.f32 0.5, %v1433_v43  ;;  %1087 = vst [vmem:[%s1610_s22 + $0x30] sm:$0xff] %v1039_v5  ;;  %1446 = vtanh.f32 %v887_v28  ;;  %v805_v0 = vadd.f32 0.7978846, %v757_v6 }
 0x1ca   : > { %v1076_v12 = vmul.f32 %v1718_v41, %v1028_v18  ;;  %v712_v13 = vmul.f32 %v1818_v11, %v1818_v11  ;;  %1448 = vtanh.f32 %v854_v37  ;;  %v1825_v52 = vpop.f32.mrf.mxu0 }
 0x1cb   : > { %v1075_v10 = vmul.f32 %v1027_v44, %v1730_v2  ;;  %v994_v14 = vadd.f32 0.5, %v946_v29  ;;  %v853_v16 = vmul.f32 %v805_v0, %v1807_v45  ;;  %v711_v21 = vmul.f32 %v1825_v52, %v1825_v52 }
 0x1cc   : > { %1124 = vst [vmem:[%s1610_s22 + $0x158] sm:$0xff] %v1076_v12  ;;  %v760_v19 = vmul.f32 0.035677407, %v712_v13  ;;  %v1833_v62 = vpop.f32.mrf.mxu0 }
 0x1cd   : > { %v1435_v41 = vpop.eup %1434  ;;  %1123 = vst [vmem:[%s1610_s22 + $0x150] sm:$0xff] %v1075_v10  ;;  %v1042_v23 = vmul.f32 %v1742_v15, %v994_v14  ;;  %1450 = vtanh.f32 %v853_v16  ;;  %v759_v26 = vmul.f32 0.035677407, %v711_v21  ;;  %v714_v20 = vmul.f32 %v1833_v62, %v1833_v62 }
 0x1ce   : > { %v1437_v38 = vpop.eup %1436  ;;  %v945_v2 = vmul.f32 0.5, %v1435_v41  ;;  %v808_v24 = vadd.f32 0.7978846, %v760_v19  ;;  %v1838_v27 = vpop.f32.mrf.mxu0 }
 0x1cf   : > { %1090 = vst [vmem:[%s1610_s22 + $0x48] sm:$0xff] %v1042_v23  ;;  %v982_v57 = vmul.f32 0.5, %v1437_v38  ;;  %v807_v34 = vadd.f32 0.7978846, %v759_v26  ;;  %v713_v15 = vmul.f32 %v1838_v27, %v1838_v27  ;;  %v762_v3 = vmul.f32 0.035677407, %v714_v20 }
 0x1d0   : > { %v1439_v31 = vpop.eup %1438  ;;  %v993_v32 = vadd.f32 0.5, %v945_v2  ;;  %v856_v33 = vmul.f32 %v1818_v11, %v808_v24  ;;  %v1843_v7 = vpop.f32.mrf.mxu0 }
 0x1d1   : > { %v1441_v35 = vpop.eup %1440  ;;  %v1030_v8 = vadd.f32 0.5, %v982_v57  ;;  %v981_v40 = vmul.f32 0.5, %v1439_v31  ;;  %v855_v46 = vmul.f32 %v807_v34, %v1825_v52  ;;  %v810_v50 = vadd.f32 0.7978846, %v762_v3 }
 0x1d2   : > { %v1041_v30 = vmul.f32 %v993_v32, %v1755_v25  ;;  %v948_v42 = vmul.f32 0.5, %v1441_v35  ;;  %1452 = vtanh.f32 %v856_v33  ;;  %v761_v17 = vmul.f32 0.035677407, %v713_v15  ;;  %v1848_v54 = vpop.f32.mrf.mxu0 }
 0x1d3   : > { %v1443_v47 = vpop.eup %1442  ;;  %v1078_v48 = vmul.f32 %v1748_v22, %v1030_v8  ;;  %v1029_v49 = vadd.f32 0.5, %v981_v40  ;;  %1454 = vtanh.f32 %v855_v46  ;;  %v716_v25 = vmul.f32 %v1843_v7, %v1843_v7 }
 0x1d4   : > { %1089 = vst [vmem:[%s1610_s22 + $0x40] sm:$0xff] %v1041_v30  ;;  %v996_v55 = vadd.f32 0.5, %v948_v42  ;;  %v947_v56 = vmul.f32 0.5, %v1443_v47  ;;  %v858_v59 = vmul.f32 %v1833_v62, %v810_v50  ;;  %v809_v36 = vadd.f32 0.7978846, %v761_v17  ;;  %v1858_v61 = vpop.f32.mrf.mxu0 }
 0x1d5   : > { %1126 = vst [vmem:[%s1610_s22 + $0x168] sm:$0xff] %v1078_v48  ;;  %v1077_v58 = vmul.f32 %v1029_v49, %v1764_v51  ;;  %v715_v22 = vmul.f32 %v1848_v54, %v1848_v54  ;;  %v1445_v1 = vpop.eup %1444  ;;  %v764_v43 = vmul.f32 0.035677407, %v716_v25  ;;  %v718_v5 = vmul.f32 %v1858_v61, %v1858_v61 }
 0x1d6   : > { %v1044_v28 = vmul.f32 %v1769_v60, %v996_v55  ;;  %v995_v4 = vadd.f32 0.5, %v947_v56  ;;  %v1447_v18 = vpop.eup %1446  ;;  %v984_v51 = vmul.f32 0.5, %v1445_v1  ;;  %1456 = vtanh.f32 %v858_v59  ;;  %v1865_v29 = vpop.f32.mrf.mxu0 }
 0x1d7   : > { %1125 = vst [vmem:[%s1610_s22 + $0x160] sm:$0xff] %v1077_v58  ;;  %v857_v6 = vmul.f32 %v809_v36, %v1838_v27  ;;  %v763_v44 = vmul.f32 0.035677407, %v715_v22  ;;  %v1449_v37 = vpop.eup %1448  ;;  %v983_v60 = vmul.f32 0.5, %v1447_v18  ;;  %v812_v0 = vadd.f32 0.7978846, %v764_v43 }
 0x1d8   : > { %1092 = vst [vmem:[%s1610_s22 + $0x58] sm:$0xff] %v1044_v28  ;;  %v1043_v12 = vmul.f32 %v995_v4, %v1780_v9  ;;  %v766_v13 = vmul.f32 0.035677407, %v718_v5  ;;  %v1032_v10 = vadd.f32 0.5, %v984_v51  ;;  %v950_v14 = vmul.f32 0.5, %v1449_v37  ;;  %v1869_v19 = vpop.f32.mrf.mxu0 }
 0x1d9   : > { %1458 = vtanh.f32 %v857_v6  ;;  %v811_v16 = vadd.f32 0.7978846, %v763_v44  ;;  %v1031_v21 = vadd.f32 0.5, %v983_v60  ;;  %v860_v41 = vmul.f32 %v1843_v7, %v812_v0 }
 0x1da   : > { %1091 = vst [vmem:[%s1610_s22 + $0x50] sm:$0xff] %v1043_v12  ;;  %v814_v23 = vadd.f32 0.7978846, %v766_v13  ;;  %v717_v38 = vmul.f32 %v1865_v29, %v1865_v29  ;;  %v1451_v9 = vpop.eup %1450  ;;  %v1080_v2 = vmul.f32 %v1771_v63, %v1032_v10  ;;  %v998_v24 = vadd.f32 0.5, %v950_v14  ;;  %v1879_v20 = vpop.f32.mrf.mxu0 }
 0x1db   : > { %v859_v26 = vmul.f32 %v811_v16, %v1848_v54  ;;  %v720_v57 = vmul.f32 %v1869_v19, %v1869_v19  ;;  %v1079_v31 = vmul.f32 %v1031_v21, %v1785_v53  ;;  %v949_v32 = vmul.f32 0.5, %v1451_v9 }
 0x1dc   : > { %1460 = vtanh.f32 %v860_v41  ;;  %v862_v33 = vmul.f32 %v1858_v61, %v814_v23  ;;  %1128 = vst [vmem:[%s1610_s22 + $0x178] sm:$0xff] %v1080_v2  ;;  %v1046_v34 = vmul.f32 %v1801_v39, %v998_v24  ;;  %v765_v63 = vmul.f32 0.035677407, %v717_v38 }
 0x1dd   : > { %1462 = vtanh.f32 %v859_v26  ;;  %v768_v15 = vmul.f32 0.035677407, %v720_v57  ;;  %1127 = vst [vmem:[%s1610_s22 + $0x170] sm:$0xff] %v1079_v31  ;;  %v997_v35 = vadd.f32 0.5, %v949_v32  ;;  %v719_v8 = vmul.f32 %v1879_v20, %v1879_v20 }
 0x1de   : > { %1464 = vtanh.f32 %v862_v33  ;;  %1094 = vst [vmem:[%s1610_s22 + $0x68] sm:$0xff] %v1046_v34  ;;  %v813_v53 = vadd.f32 0.7978846, %v765_v63 }
 0x1df   : > { %v1453_v40 = vpop.eup %1452  ;;  %v816_v3 = vadd.f32 0.7978846, %v768_v15  ;;  %v1045_v30 = vmul.f32 %v997_v35, %v1807_v45  ;;  %v767_v46 = vmul.f32 0.035677407, %v719_v8 }
 0x1e0   : > { %v952_v42 = vmul.f32 0.5, %v1453_v40  ;;  %v1455_v39 = vpop.eup %1454  ;;  %v861_v47 = vmul.f32 %v813_v53, %v1865_v29 }
 0x1e1   : > { %v864_v48 = vmul.f32 %v1869_v19, %v816_v3  ;;  %1093 = vst [vmem:[%s1610_s22 + $0x60] sm:$0xff] %v1045_v30  ;;  %v951_v50 = vmul.f32 0.5, %v1455_v39  ;;  %v815_v17 = vadd.f32 0.7978846, %v767_v46 }
 0x1e2   : > { %v1000_v49 = vadd.f32 0.5, %v952_v42  ;;  %1466 = vtanh.f32 %v861_v47 }
 0x1e3   : > { %v1457_v55 = vpop.eup %1456  ;;  %v999_v25 = vadd.f32 0.5, %v951_v50  ;;  %1468 = vtanh.f32 %v864_v48  ;;  %v863_v45 = vmul.f32 %v815_v17, %v1879_v20 }
 0x1e4   : > { %v1048_v56 = vmul.f32 %v1818_v11, %v1000_v49  ;;  %v954_v58 = vmul.f32 0.5, %v1457_v55 }
 0x1e5   : > { %v1047_v36 = vmul.f32 %v999_v25, %v1825_v52  ;;  %1470 = vtanh.f32 %v863_v45 }
 0x1e6   : > { %v1459_v59 = vpop.eup %1458  ;;  %1096 = vst [vmem:[%s1610_s22 + $0x78] sm:$0xff] %v1048_v56  ;;  %v1002_v22 = vadd.f32 0.5, %v954_v58 }
 0x1e7   : > { %v953_v1 = vmul.f32 0.5, %v1459_v59  ;;  %1095 = vst [vmem:[%s1610_s22 + $0x70] sm:$0xff] %v1047_v36 }
 0x1e8   : > { %v1050_v4 = vmul.f32 %v1833_v62, %v1002_v22 }
 0x1e9   : > { %v1461_v28 = vpop.eup %1460  ;;  %v1001_v11 = vadd.f32 0.5, %v953_v1 }
 0x1ea   : > { %v1463_v43 = vpop.eup %1462  ;;  %v956_v5 = vmul.f32 0.5, %v1461_v28  ;;  %1098 = vst [vmem:[%s1610_s22 + $0x88] sm:$0xff] %v1050_v4 }
 0x1eb   : > { %v1465_v18 = vpop.eup %1464  ;;  %v1049_v51 = vmul.f32 %v1001_v11, %v1838_v27  ;;  %v955_v6 = vmul.f32 0.5, %v1463_v43 }
 0x1ec   : > { %v1004_v52 = vadd.f32 0.5, %v956_v5  ;;  %v958_v44 = vmul.f32 0.5, %v1465_v18 }
 0x1ed   : > { %1097 = vst [vmem:[%s1610_s22 + $0x80] sm:$0xff] %v1049_v51  ;;  %v1003_v37 = vadd.f32 0.5, %v955_v6 }
 0x1ee   : > { %v1052_v12 = vmul.f32 %v1843_v7, %v1004_v52  ;;  %v1006_v60 = vadd.f32 0.5, %v958_v44 }
 0x1ef   : > { %v1051_v62 = vmul.f32 %v1003_v37, %v1848_v54  ;;  %v1467_v0 = vpop.eup %1466 }
 0x1f0   : > { %1100 = vst [vmem:[%s1610_s22 + $0x98] sm:$0xff] %v1052_v12  ;;  %v1054_v13 = vmul.f32 %v1858_v61, %v1006_v60  ;;  %v1469_v10 = vpop.eup %1468  ;;  %v957_v27 = vmul.f32 0.5, %v1467_v0 }
 0x1f1   : > { %1099 = vst [vmem:[%s1610_s22 + $0x90] sm:$0xff] %v1051_v62  ;;  %v960_v14 = vmul.f32 0.5, %v1469_v10 }
 0x1f2   : > { %1102 = vst [vmem:[%s1610_s22 + $0xa8] sm:$0xff] %v1054_v13  ;;  %v1471_v16 = vpop.eup %1470  ;;  %v1005_v21 = vadd.f32 0.5, %v957_v27 }
 0x1f3   : > { %v1008_v41 = vadd.f32 0.5, %v960_v14  ;;  %v959_v23 = vmul.f32 0.5, %v1471_v16 }
 0x1f4   : > { %v1053_v7 = vmul.f32 %v1005_v21, %v1865_v29 }
 0x1f5   : > { %v1056_v54 = vmul.f32 %v1869_v19, %v1008_v41  ;;  %v1007_v38 = vadd.f32 0.5, %v959_v23 }
 0x1f6   : > { %1101 = vst [vmem:[%s1610_s22 + $0xa0] sm:$0xff] %v1053_v7 }
 0x1f7   : > { %1104 = vst [vmem:[%s1610_s22 + $0xb8] sm:$0xff] %v1056_v54  ;;  %v1055_v9 = vmul.f32 %v1007_v38, %v1879_v20 }
 0x1f9   : > { %1103 = vst [vmem:[%s1610_s22 + $0xb0] sm:$0xff] %v1055_v9 }
 0x1fa PF: > { %s12_s9 = sadd.s32 1, %s1478_s9  }
 0x1fb   : > { %p9_p5 = scmp.ge.s32.totalorder %s12_s9, 4  }
 0x1fd   :  { %11 = sbr.rel (!%p9_p5) target bundleno = 1 (0x1), region = 58 }

</bundles_post_ra>
